<compile_context>
chip_gen: v6e
topology: v6e:2x2x1
jax: 0.10.0
libtpu: 0.0.40
codegen_flags: <defaults>
</compile_context>

<pallas_src>
import jax
import jax.numpy as jnp
from jax import lax
from jax.experimental import pallas as pl
from jax.experimental.pallas import tpu as pltpu


def _round_up(n, m):
    return ((n + m - 1) // m) * m


def decoder_kernel(x_ref, h0_ref, wxh_ref, b_ref, wout_ref, bout_ref,
                   out_ref, hn_ref, hs_ref):
    S, B, Hp = x_ref.shape

    # Hoist the fused recurrence weight load and the bias broadcast out of the time loop.
    wxh = wxh_ref[...]                                   # (2Hp, Hp)
    bias = jnp.broadcast_to(b_ref[...], (B, Hp))         # (B, Hp), b_ih + b_hh pre-summed

    def step(t, h):
        x_t = x_ref[t]                                   # (B, Hp) embedded input at step t
        xh = jnp.concatenate([x_t, h], axis=-1)          # (B, 2Hp)
        # h_t = tanh([x_t, h_{t-1}] @ [W_ih^T; W_hh^T] + (b_ih + b_hh))
        h_new = jnp.tanh(
            jnp.dot(xh, wxh, preferred_element_type=jnp.float32) + bias)
        row = pl.multiple_of(t * B, B)
        hs_ref[pl.ds(row, B), :] = h_new                 # stage h_t for the fused projection
        return h_new

    h_last = lax.fori_loop(0, S, step, h0_ref[...].astype(jnp.float32),
                           unroll=True)

    hn_ref[...] = h_last.astype(hn_ref.dtype)

    # Single lane-dense output projection over all timesteps at once:
    # (S*B, Hp) @ (Hp, Op) + b_out
    out_ref[...] = (jnp.dot(hs_ref[...], wout_ref[...],
                            preferred_element_type=jnp.float32)
                    + bout_ref[...]).astype(out_ref.dtype)


def decoder_pallas(x_sbh, h0, w_xh, b, w_out_t, b_out):
    """x_sbh: (S, B, Hp) f32; h0: (B, Hp); w_xh: (2Hp, Hp); b: (1, Hp);
    w_out_t: (Hp, Op); b_out: (1, Op).  Returns (logits (S*B, Op), h_n (B, Hp))."""
    S, B, Hp = x_sbh.shape
    Op = w_out_t.shape[1]

    grid_spec = pltpu.PrefetchScalarGridSpec(
        num_scalar_prefetch=0,
        grid=(1,),                                        # whole recurrence in one invocation
        in_specs=[
            pl.BlockSpec((S, B, Hp), lambda i: (0, 0, 0)),   # embedded inputs (time-major)
            pl.BlockSpec((B, Hp), lambda i: (0, 0)),         # h0
            pl.BlockSpec((2 * Hp, Hp), lambda i: (0, 0)),    # [W_ih^T; W_hh^T]
            pl.BlockSpec((1, Hp), lambda i: (0, 0)),         # b_ih + b_hh
            pl.BlockSpec((Hp, Op), lambda i: (0, 0)),        # W_out^T
            pl.BlockSpec((1, Op), lambda i: (0, 0)),         # b_out
        ],
        out_specs=[
            pl.BlockSpec((S * B, Op), lambda i: (0, 0)),     # flat lane-dense logits
            pl.BlockSpec((B, Hp), lambda i: (0, 0)),         # final hidden
        ],
        scratch_shapes=[pltpu.VMEM((S * B, Hp), jnp.float32)],   # staged hidden states
    )

    out_flat, h_n = pl.pallas_call(
        decoder_kernel,
        out_shape=(jax.ShapeDtypeStruct((S * B, Op), jnp.float32),
                   jax.ShapeDtypeStruct((B, Hp), jnp.float32)),
        grid_spec=grid_spec,
        compiler_params=pltpu.CompilerParams(
            dimension_semantics=("arbitrary",)),   # recurrence is sequential
    )(x_sbh, h0, w_xh, b, w_out_t, b_out)
    return out_flat, h_n


def decoder_forward(inputs, hidden, params):
    """Mirrors Decoder.forward.

    inputs : (B, S) int32 token ids
    hidden : (1, B, H) f32
    returns (output (B, S, O), hidden (1, B, H))
    """
    B, S = inputs.shape
    H = params["w_ih"].shape[0]
    O = params["w_out"].shape[0]
    Hp = _round_up(H, 128)
    Op = _round_up(O, 128)

    emb = params["embedding"]                      # (O, H)
    # Embedding lookup is glue (pure gather); gather time-major directly.
    x_sbh = emb[inputs.T]                          # (S, B, H)
    x_sbh = jnp.pad(x_sbh, ((0, 0), (0, 0), (0, Hp - H)))          # (S, B, Hp)

    h0 = jnp.pad(hidden[0], ((0, 0), (0, Hp - H)))                  # (B, Hp)

    wih_t = jnp.pad(params["w_ih"].T, ((0, Hp - H), (0, Hp - H)))   # (Hp, Hp)
    whh_t = jnp.pad(params["w_hh"].T, ((0, Hp - H), (0, Hp - H)))   # (Hp, Hp)
    w_xh = jnp.concatenate([wih_t, whh_t], axis=0)                  # (2Hp, Hp)

    b = jnp.pad((params["b_ih"] + params["b_hh"])[None, :],
                ((0, 0), (0, Hp - H)))                              # (1, Hp)

    w_out_t = jnp.pad(params["w_out"].T, ((0, Hp - H), (0, Op - O)))  # (Hp, Op)
    b_out = jnp.pad(params["b_out"][None, :], ((0, 0), (0, Op - O)))  # (1, Op)

    out_flat, h_n = decoder_pallas(x_sbh, h0, w_xh, b, w_out_t, b_out)

    output = out_flat.reshape(S, B, Op).transpose(1, 0, 2)[:, :, :O]  # (B, S, O)
    return output, h_n[:, :H][None, :, :]


def decoder_reference(inputs, hidden, params):
    """Pure-JAX reference (lax.scan) for correctness checking."""
    emb = params["embedding"][inputs]          # (B, S, H)
    emb_t = jnp.transpose(emb, (1, 0, 2))      # (S, B, H)
    h0 = hidden[0]

    def step(h, x):
        h_new = jnp.tanh(x @ params["w_ih"].T + params["b_ih"]
                         + h @ params["w_hh"].T + params["b_hh"])
        return h_new, h_new

    h_last, hs = lax.scan(step, h0, emb_t)     # hs: (S, B, H)
    out = hs @ params["w_out"].T + params["b_out"]
    return jnp.transpose(out, (1, 0, 2)), h_last[None]


def init_params(key, hidden_size, output_size):
    ks = jax.random.split(key, 7)
    s = 1.0 / jnp.sqrt(hidden_size)
    return {
        "embedding": jax.random.normal(ks[0], (output_size, hidden_size), jnp.float32),
        "w_ih": jax.random.uniform(ks[1], (hidden_size, hidden_size), jnp.float32, -s, s),
        "w_hh": jax.random.uniform(ks[2], (hidden_size, hidden_size), jnp.float32, -s, s),
        "b_ih": jax.random.uniform(ks[3], (hidden_size,), jnp.float32, -s, s),
        "b_hh": jax.random.uniform(ks[4], (hidden_size,), jnp.float32, -s, s),
        "w_out": jax.random.uniform(ks[5], (output_size, hidden_size), jnp.float32, -s, s),
        "b_out": jax.random.uniform(ks[6], (output_size,), jnp.float32, -s, s),
    }


if __name__ == "__main__":
    B, S, H, O = 8, 8, 32, 16   # batch, seq, hidden_size, output_size (vocab)

    key = jax.random.PRNGKey(0)
    k_par, k_inp, k_hid = jax.random.split(key, 3)

    params = init_params(k_par, H, O)
    inputs = jax.random.randint(k_inp, (B, S), 0, O, dtype=jnp.int32)
    hidden = jax.random.normal(k_hid, (1, B, H), jnp.float32)

    out, h_n = jax.jit(decoder_forward)(inputs, hidden, params)
    jax.block_until_ready((out, h_n))

    out_ref, h_ref = decoder_reference(inputs, hidden, params)
    assert out.shape == (B, S, O) and h_n.shape == (1, B, H)
    assert jnp.allclose(out, out_ref, atol=1e-4, rtol=1e-4)
    assert jnp.allclose(h_n, h_ref, atol=1e-4, rtol=1e-4)

    print("KERNEL_OK")
</pallas_src>

<mosaic_0001>
module attributes {stable_mosaic.version = 11 : i64} {
  func.func @decoder_kernel(%arg0: i32, %arg1: memref<8x8x128xf32, #tpu.memory_space<vmem>>, %arg2: memref<8x128xf32, #tpu.memory_space<vmem>>, %arg3: memref<256x128xf32, #tpu.memory_space<vmem>>, %arg4: memref<1x128xf32, #tpu.memory_space<vmem>>, %arg5: memref<128x128xf32, #tpu.memory_space<vmem>>, %arg6: memref<1x128xf32, #tpu.memory_space<vmem>>, %arg7: memref<64x128xf32, #tpu.memory_space<vmem>>, %arg8: memref<8x128xf32, #tpu.memory_space<vmem>>, %arg9: memref<64x128xf32, #tpu.memory_space<vmem>>) attributes {dimension_semantics = [#tpu.dimension_semantics<arbitrary>], iteration_bounds = array<i64: 1>, scalar_prefetch = 0 : i64, scratch_operands = 1 : i64, tpu.core_type = #tpu.core_type<tc>, window_params = [{pipeline_mode = #tpu.pipeline_mode<synchronous>, transform_indices = @transform_0, window_bounds = array<i64: 8, 8, 128>}, {pipeline_mode = #tpu.pipeline_mode<synchronous>, transform_indices = @transform_1, window_bounds = array<i64: 8, 128>}, {pipeline_mode = #tpu.pipeline_mode<synchronous>, transform_indices = @transform_2, window_bounds = array<i64: 256, 128>}, {pipeline_mode = #tpu.pipeline_mode<synchronous>, transform_indices = @transform_3, window_bounds = array<i64: 1, 128>}, {pipeline_mode = #tpu.pipeline_mode<synchronous>, transform_indices = @transform_4, window_bounds = array<i64: 128, 128>}, {pipeline_mode = #tpu.pipeline_mode<synchronous>, transform_indices = @transform_5, window_bounds = array<i64: 1, 128>}, {pipeline_mode = #tpu.pipeline_mode<synchronous>, transform_indices = @transform_6, window_bounds = array<i64: 64, 128>}, {pipeline_mode = #tpu.pipeline_mode<synchronous>, transform_indices = @transform_7, window_bounds = array<i64: 8, 128>}]} {
    %c0 = arith.constant 0 : index
    %c0_0 = arith.constant 0 : index
    %0 = vector.load %arg3[%c0, %c0_0] : memref<256x128xf32, #tpu.memory_space<vmem>>, vector<256x128xf32>
    %c0_1 = arith.constant 0 : index
    %c0_2 = arith.constant 0 : index
    %1 = vector.load %arg4[%c0_1, %c0_2] : memref<1x128xf32, #tpu.memory_space<vmem>>, vector<1x128xf32>
    %2 = vector.shape_cast %1 : vector<1x128xf32> to vector<1x128xf32>
    %3 = vector.broadcast %2 : vector<1x128xf32> to vector<8x128xf32>
    %c0_3 = arith.constant 0 : index
    %c0_4 = arith.constant 0 : index
    %4 = vector.load %arg2[%c0_3, %c0_4] : memref<8x128xf32, #tpu.memory_space<vmem>>, vector<8x128xf32>
    %c0_i32 = arith.constant 0 : i32
    %5 = arith.index_cast %c0_i32 : i32 to index
    %c0_5 = arith.constant 0 : index
    %c0_6 = arith.constant 0 : index
    %6 = vector.load %arg1[%5, %c0_5, %c0_6] : memref<8x8x128xf32, #tpu.memory_space<vmem>>, vector<1x8x128xf32>
    %7 = vector.shape_cast %6 : vector<1x8x128xf32> to vector<8x128xf32>
    %8 = tpu.concatenate %7, %4 in 1 : vector<8x128xf32>, vector<8x128xf32> -> vector<8x256xf32>
    %cst = arith.constant dense<0.000000e+00> : vector<8x128xf32>
    %9 = tpu.matmul %8, %0, %cst {dimension_numbers = #tpu.dot_dimension_numbers<[1], [0], [0], [1], [0, 0, 1, 1], [], []>} : vector<8x256xf32>, vector<256x128xf32>, vector<8x128xf32> -> vector<8x128xf32>
    %10 = arith.addf %9, %3 : vector<8x128xf32>
    %11 = math.tanh %10 : vector<8x128xf32>
    %c8_i32 = arith.constant 8 : i32
    %12 = arith.muli %c0_i32, %c8_i32 : i32
    %13 = tpu.assume_multiple %12, 8 : i32
    %14 = arith.index_cast %13 : i32 to index
    %c0_7 = arith.constant 0 : index
    %15 = vector.load %arg9[%14, %c0_7] : memref<64x128xf32, #tpu.memory_space<vmem>>, vector<8x128xf32>
    tpu.vector_store %arg9[%14, %c0_7], %11 {strides = array<i32>} : memref<64x128xf32, #tpu.memory_space<vmem>>, vector<8x128xf32>,
    %c1_i32 = arith.constant 1 : i32
    %16 = arith.index_cast %c1_i32 : i32 to index
    %c0_8 = arith.constant 0 : index
    %c0_9 = arith.constant 0 : index
    %17 = vector.load %arg1[%16, %c0_8, %c0_9] : memref<8x8x128xf32, #tpu.memory_space<vmem>>, vector<1x8x128xf32>
    %18 = vector.shape_cast %17 : vector<1x8x128xf32> to vector<8x128xf32>
    %19 = tpu.concatenate %18, %11 in 1 : vector<8x128xf32>, vector<8x128xf32> -> vector<8x256xf32>
    %cst_10 = arith.constant dense<0.000000e+00> : vector<8x128xf32>
    %20 = tpu.matmul %19, %0, %cst_10 {dimension_numbers = #tpu.dot_dimension_numbers<[1], [0], [0], [1], [0, 0, 1, 1], [], []>} : vector<8x256xf32>, vector<256x128xf32>, vector<8x128xf32> -> vector<8x128xf32>
    %21 = arith.addf %20, %3 : vector<8x128xf32>
    %22 = math.tanh %21 : vector<8x128xf32>
    %c8_i32_11 = arith.constant 8 : i32
    %23 = arith.muli %c1_i32, %c8_i32_11 : i32
    %24 = tpu.assume_multiple %23, 8 : i32
    %25 = arith.index_cast %24 : i32 to index
    %c0_12 = arith.constant 0 : index
    %26 = vector.load %arg9[%25, %c0_12] : memref<64x128xf32, #tpu.memory_space<vmem>>, vector<8x128xf32>
    tpu.vector_store %arg9[%25, %c0_12], %22 {strides = array<i32>} : memref<64x128xf32, #tpu.memory_space<vmem>>, vector<8x128xf32>,
    %c2_i32 = arith.constant 2 : i32
    %27 = arith.index_cast %c2_i32 : i32 to index
    %c0_13 = arith.constant 0 : index
    %c0_14 = arith.constant 0 : index
    %28 = vector.load %arg1[%27, %c0_13, %c0_14] : memref<8x8x128xf32, #tpu.memory_space<vmem>>, vector<1x8x128xf32>
    %29 = vector.shape_cast %28 : vector<1x8x128xf32> to vector<8x128xf32>
    %30 = tpu.concatenate %29, %22 in 1 : vector<8x128xf32>, vector<8x128xf32> -> vector<8x256xf32>
    %cst_15 = arith.constant dense<0.000000e+00> : vector<8x128xf32>
    %31 = tpu.matmul %30, %0, %cst_15 {dimension_numbers = #tpu.dot_dimension_numbers<[1], [0], [0], [1], [0, 0, 1, 1], [], []>} : vector<8x256xf32>, vector<256x128xf32>, vector<8x128xf32> -> vector<8x128xf32>
    %32 = arith.addf %31, %3 : vector<8x128xf32>
    %33 = math.tanh %32 : vector<8x128xf32>
    %c8_i32_16 = arith.constant 8 : i32
    %34 = arith.muli %c2_i32, %c8_i32_16 : i32
    %35 = tpu.assume_multiple %34, 8 : i32
    %36 = arith.index_cast %35 : i32 to index
    %c0_17 = arith.constant 0 : index
    %37 = vector.load %arg9[%36, %c0_17] : memref<64x128xf32, #tpu.memory_space<vmem>>, vector<8x128xf32>
    tpu.vector_store %arg9[%36, %c0_17], %33 {strides = array<i32>} : memref<64x128xf32, #tpu.memory_space<vmem>>, vector<8x128xf32>,
    %c3_i32 = arith.constant 3 : i32
    %38 = arith.index_cast %c3_i32 : i32 to index
    %c0_18 = arith.constant 0 : index
    %c0_19 = arith.constant 0 : index
    %39 = vector.load %arg1[%38, %c0_18, %c0_19] : memref<8x8x128xf32, #tpu.memory_space<vmem>>, vector<1x8x128xf32>
    %40 = vector.shape_cast %39 : vector<1x8x128xf32> to vector<8x128xf32>
    %41 = tpu.concatenate %40, %33 in 1 : vector<8x128xf32>, vector<8x128xf32> -> vector<8x256xf32>
    %cst_20 = arith.constant dense<0.000000e+00> : vector<8x128xf32>
    %42 = tpu.matmul %41, %0, %cst_20 {dimension_numbers = #tpu.dot_dimension_numbers<[1], [0], [0], [1], [0, 0, 1, 1], [], []>} : vector<8x256xf32>, vector<256x128xf32>, vector<8x128xf32> -> vector<8x128xf32>
    %43 = arith.addf %42, %3 : vector<8x128xf32>
    %44 = math.tanh %43 : vector<8x128xf32>
    %c8_i32_21 = arith.constant 8 : i32
    %45 = arith.muli %c3_i32, %c8_i32_21 : i32
    %46 = tpu.assume_multiple %45, 8 : i32
    %47 = arith.index_cast %46 : i32 to index
    %c0_22 = arith.constant 0 : index
    %48 = vector.load %arg9[%47, %c0_22] : memref<64x128xf32, #tpu.memory_space<vmem>>, vector<8x128xf32>
    tpu.vector_store %arg9[%47, %c0_22], %44 {strides = array<i32>} : memref<64x128xf32, #tpu.memory_space<vmem>>, vector<8x128xf32>,
    %c4_i32 = arith.constant 4 : i32
    %49 = arith.index_cast %c4_i32 : i32 to index
    %c0_23 = arith.constant 0 : index
    %c0_24 = arith.constant 0 : index
    %50 = vector.load %arg1[%49, %c0_23, %c0_24] : memref<8x8x128xf32, #tpu.memory_space<vmem>>, vector<1x8x128xf32>
    %51 = vector.shape_cast %50 : vector<1x8x128xf32> to vector<8x128xf32>
    %52 = tpu.concatenate %51, %44 in 1 : vector<8x128xf32>, vector<8x128xf32> -> vector<8x256xf32>
    %cst_25 = arith.constant dense<0.000000e+00> : vector<8x128xf32>
    %53 = tpu.matmul %52, %0, %cst_25 {dimension_numbers = #tpu.dot_dimension_numbers<[1], [0], [0], [1], [0, 0, 1, 1], [], []>} : vector<8x256xf32>, vector<256x128xf32>, vector<8x128xf32> -> vector<8x128xf32>
    %54 = arith.addf %53, %3 : vector<8x128xf32>
    %55 = math.tanh %54 : vector<8x128xf32>
    %c8_i32_26 = arith.constant 8 : i32
    %56 = arith.muli %c4_i32, %c8_i32_26 : i32
    %57 = tpu.assume_multiple %56, 8 : i32
    %58 = arith.index_cast %57 : i32 to index
    %c0_27 = arith.constant 0 : index
    %59 = vector.load %arg9[%58, %c0_27] : memref<64x128xf32, #tpu.memory_space<vmem>>, vector<8x128xf32>
    tpu.vector_store %arg9[%58, %c0_27], %55 {strides = array<i32>} : memref<64x128xf32, #tpu.memory_space<vmem>>, vector<8x128xf32>,
    %c5_i32 = arith.constant 5 : i32
    %60 = arith.index_cast %c5_i32 : i32 to index
    %c0_28 = arith.constant 0 : index
    %c0_29 = arith.constant 0 : index
    %61 = vector.load %arg1[%60, %c0_28, %c0_29] : memref<8x8x128xf32, #tpu.memory_space<vmem>>, vector<1x8x128xf32>
    %62 = vector.shape_cast %61 : vector<1x8x128xf32> to vector<8x128xf32>
    %63 = tpu.concatenate %62, %55 in 1 : vector<8x128xf32>, vector<8x128xf32> -> vector<8x256xf32>
    %cst_30 = arith.constant dense<0.000000e+00> : vector<8x128xf32>
    %64 = tpu.matmul %63, %0, %cst_30 {dimension_numbers = #tpu.dot_dimension_numbers<[1], [0], [0], [1], [0, 0, 1, 1], [], []>} : vector<8x256xf32>, vector<256x128xf32>, vector<8x128xf32> -> vector<8x128xf32>
    %65 = arith.addf %64, %3 : vector<8x128xf32>
    %66 = math.tanh %65 : vector<8x128xf32>
    %c8_i32_31 = arith.constant 8 : i32
    %67 = arith.muli %c5_i32, %c8_i32_31 : i32
    %68 = tpu.assume_multiple %67, 8 : i32
    %69 = arith.index_cast %68 : i32 to index
    %c0_32 = arith.constant 0 : index
    %70 = vector.load %arg9[%69, %c0_32] : memref<64x128xf32, #tpu.memory_space<vmem>>, vector<8x128xf32>
    tpu.vector_store %arg9[%69, %c0_32], %66 {strides = array<i32>} : memref<64x128xf32, #tpu.memory_space<vmem>>, vector<8x128xf32>,
    %c6_i32 = arith.constant 6 : i32
    %71 = arith.index_cast %c6_i32 : i32 to index
    %c0_33 = arith.constant 0 : index
    %c0_34 = arith.constant 0 : index
    %72 = vector.load %arg1[%71, %c0_33, %c0_34] : memref<8x8x128xf32, #tpu.memory_space<vmem>>, vector<1x8x128xf32>
    %73 = vector.shape_cast %72 : vector<1x8x128xf32> to vector<8x128xf32>
    %74 = tpu.concatenate %73, %66 in 1 : vector<8x128xf32>, vector<8x128xf32> -> vector<8x256xf32>
    %cst_35 = arith.constant dense<0.000000e+00> : vector<8x128xf32>
    %75 = tpu.matmul %74, %0, %cst_35 {dimension_numbers = #tpu.dot_dimension_numbers<[1], [0], [0], [1], [0, 0, 1, 1], [], []>} : vector<8x256xf32>, vector<256x128xf32>, vector<8x128xf32> -> vector<8x128xf32>
    %76 = arith.addf %75, %3 : vector<8x128xf32>
    %77 = math.tanh %76 : vector<8x128xf32>
    %c8_i32_36 = arith.constant 8 : i32
    %78 = arith.muli %c6_i32, %c8_i32_36 : i32
    %79 = tpu.assume_multiple %78, 8 : i32
    %80 = arith.index_cast %79 : i32 to index
    %c0_37 = arith.constant 0 : index
    %81 = vector.load %arg9[%80, %c0_37] : memref<64x128xf32, #tpu.memory_space<vmem>>, vector<8x128xf32>
    tpu.vector_store %arg9[%80, %c0_37], %77 {strides = array<i32>} : memref<64x128xf32, #tpu.memory_space<vmem>>, vector<8x128xf32>,
    %c7_i32 = arith.constant 7 : i32
    %82 = arith.index_cast %c7_i32 : i32 to index
    %c0_38 = arith.constant 0 : index
    %c0_39 = arith.constant 0 : index
    %83 = vector.load %arg1[%82, %c0_38, %c0_39] : memref<8x8x128xf32, #tpu.memory_space<vmem>>, vector<1x8x128xf32>
    %84 = vector.shape_cast %83 : vector<1x8x128xf32> to vector<8x128xf32>
    %85 = tpu.concatenate %84, %77 in 1 : vector<8x128xf32>, vector<8x128xf32> -> vector<8x256xf32>
    %cst_40 = arith.constant dense<0.000000e+00> : vector<8x128xf32>
    %86 = tpu.matmul %85, %0, %cst_40 {dimension_numbers = #tpu.dot_dimension_numbers<[1], [0], [0], [1], [0, 0, 1, 1], [], []>} : vector<8x256xf32>, vector<256x128xf32>, vector<8x128xf32> -> vector<8x128xf32>
    %87 = arith.addf %86, %3 : vector<8x128xf32>
    %88 = math.tanh %87 : vector<8x128xf32>
    %c8_i32_41 = arith.constant 8 : i32
    %89 = arith.muli %c7_i32, %c8_i32_41 : i32
    %90 = tpu.assume_multiple %89, 8 : i32
    %91 = arith.index_cast %90 : i32 to index
    %c0_42 = arith.constant 0 : index
    %92 = vector.load %arg9[%91, %c0_42] : memref<64x128xf32, #tpu.memory_space<vmem>>, vector<8x128xf32>
    tpu.vector_store %arg9[%91, %c0_42], %88 {strides = array<i32>} : memref<64x128xf32, #tpu.memory_space<vmem>>, vector<8x128xf32>,
    %c8_i32_43 = arith.constant 8 : i32
    %c0_44 = arith.constant 0 : index
    %c0_45 = arith.constant 0 : index
    %93 = vector.load %arg8[%c0_44, %c0_45] : memref<8x128xf32, #tpu.memory_space<vmem>>, vector<8x128xf32>
    tpu.vector_store %arg8[%c0_44, %c0_45], %88 {strides = array<i32>} : memref<8x128xf32, #tpu.memory_space<vmem>>, vector<8x128xf32>,
    %c0_46 = arith.constant 0 : index
    %c0_47 = arith.constant 0 : index
    %94 = vector.load %arg9[%c0_46, %c0_47] : memref<64x128xf32, #tpu.memory_space<vmem>>, vector<64x128xf32>
    %c0_48 = arith.constant 0 : index
    %c0_49 = arith.constant 0 : index
    %95 = vector.load %arg5[%c0_48, %c0_49] : memref<128x128xf32, #tpu.memory_space<vmem>>, vector<128x128xf32>
    %cst_50 = arith.constant dense<0.000000e+00> : vector<64x128xf32>
    %96 = tpu.matmul %94, %95, %cst_50 {dimension_numbers = #tpu.dot_dimension_numbers<[1], [0], [0], [1], [0, 0, 1, 1], [], []>} : vector<64x128xf32>, vector<128x128xf32>, vector<64x128xf32> -> vector<64x128xf32>
    %c0_51 = arith.constant 0 : index
    %c0_52 = arith.constant 0 : index
    %97 = vector.load %arg6[%c0_51, %c0_52] : memref<1x128xf32, #tpu.memory_space<vmem>>, vector<1x128xf32>
    %98 = vector.broadcast %97 : vector<1x128xf32> to vector<64x128xf32>
    %99 = arith.addf %96, %98 : vector<64x128xf32>
    %c0_53 = arith.constant 0 : index
    %c0_54 = arith.constant 0 : index
    %100 = vector.load %arg7[%c0_53, %c0_54] : memref<64x128xf32, #tpu.memory_space<vmem>>, vector<64x128xf32>
    tpu.vector_store %arg7[%c0_53, %c0_54], %99 {strides = array<i32>} : memref<64x128xf32, #tpu.memory_space<vmem>>, vector<64x128xf32>,
    return
  }
  func.func @transform_0(%arg0: i32) -> (i32, i32, i32) {
    %c0_i32 = arith.constant 0 : i32
    %c0_i32_0 = arith.constant 0 : i32
    %c0_i32_1 = arith.constant 0 : i32
    %c0_i32_2 = arith.constant 0 : i32
    return %c0_i32, %c0_i32_0, %c0_i32_1 : i32, i32, i32
  }
  func.func @transform_1(%arg0: i32) -> (i32, i32) {
    %c0_i32 = arith.constant 0 : i32
    %c0_i32_0 = arith.constant 0 : i32
    %c0_i32_1 = arith.constant 0 : i32
    return %c0_i32, %c0_i32_0 : i32, i32
  }
  func.func @transform_2(%arg0: i32) -> (i32, i32) {
    %c0_i32 = arith.constant 0 : i32
    %c0_i32_0 = arith.constant 0 : i32
    %c0_i32_1 = arith.constant 0 : i32
    return %c0_i32, %c0_i32_0 : i32, i32
  }
  func.func @transform_3(%arg0: i32) -> (i32, i32) {
    %c0_i32 = arith.constant 0 : i32
    %c0_i32_0 = arith.constant 0 : i32
    %c0_i32_1 = arith.constant 0 : i32
    return %c0_i32, %c0_i32_0 : i32, i32
  }
  func.func @transform_4(%arg0: i32) -> (i32, i32) {
    %c0_i32 = arith.constant 0 : i32
    %c0_i32_0 = arith.constant 0 : i32
    %c0_i32_1 = arith.constant 0 : i32
    return %c0_i32, %c0_i32_0 : i32, i32
  }
  func.func @transform_5(%arg0: i32) -> (i32, i32) {
    %c0_i32 = arith.constant 0 : i32
    %c0_i32_0 = arith.constant 0 : i32
    %c0_i32_1 = arith.constant 0 : i32
    return %c0_i32, %c0_i32_0 : i32, i32
  }
  func.func @transform_6(%arg0: i32) -> (i32, i32) {
    %c0_i32 = arith.constant 0 : i32
    %c0_i32_0 = arith.constant 0 : i32
    %c0_i32_1 = arith.constant 0 : i32
    return %c0_i32, %c0_i32_0 : i32, i32
  }
  func.func @transform_7(%arg0: i32) -> (i32, i32) {
    %c0_i32 = arith.constant 0 : i32
    %c0_i32_0 = arith.constant 0 : i32
    %c0_i32_1 = arith.constant 0 : i32
    return %c0_i32, %c0_i32_0 : i32, i32
  }
}

</mosaic_0001>

<bundles_post_ra>
// kernel: decoder_forward.1
= control target key start
LH: loop header
LB: loop body
LE: loop exit
PB: predicated region body
PF: predicated region fallthrough
CT: control target
= control target key end

     0   :  { %s1783_s2 = inlined_call_operand.vmem [shape: f32[256,128], index: 2, kind: input, shape index: {}]   ;;  %s1784_s1 = inlined_call_operand.vmem [shape: f32[8,128], index: 1, kind: input, shape index: {}]   ;;  %s1785_s0 = inlined_call_operand.vmem [shape: f32[8,8,128], index: 0, kind: input, shape index: {}]   ;;  %s1786_s3 = inlined_call_operand.vmem [shape: f32[1,128], index: 3, kind: input, shape index: {}]   ;;  %s1787_s4 = inlined_call_operand.vmem [shape: f32[128,128], index: 4, kind: input, shape index: {}]   ;;  %s1788_s5 = inlined_call_operand.vmem [shape: f32[1,128], index: 5, kind: input, shape index: {}]   ;;  %s1789_s6 = inlined_call_operand.vmem [shape: f32[64,128], index: 6, kind: output, shape index: {0}]   ;;  %s1790_s7 = inlined_call_operand.vmem [shape: f32[8,128], index: 7, kind: output, shape index: {1}]  }
   0x1   :  { %v1232_v0 = vld [vmem:[%s1783_s2 + $0xf8] sm:$0xff]  ;;  %v1242_v2 = vld [vmem:[%s1783_s2 + $0xf0] sm:$0xff]  ;;  %v1255_v4 = vld [vmem:[%s1783_s2 + $0xe8] sm:$0xff] }
   0x2   :  { %v1237_v1 = vld [vmem:[%s1783_s2 + $0x78] sm:$0xff]  ;;  %825 = vmatprep.subr.mxu1 %v1232_v0  ;;  %v1248_v3 = vld [vmem:[%s1783_s2 + $0x70] sm:$0xff]  ;;  %895 = vmatprep.subr.mxu0 %v1232_v0  ;;  %v1262_v5 = vld [vmem:[%s1783_s2 + $0x68] sm:$0xff] }
   0x3   :  { %826 = vmatpush3.msra.mxu1 %v1237_v1  ;;  %896 = vmatpush3.msra.mxu0 %v1237_v1  ;;  %v1269_v6 = vld [vmem:[%s1783_s2 + $0xe0] sm:$0xff]  ;;  %v1283_v8 = vld [vmem:[%s1783_s2 + $0xd8] sm:$0xff]  ;;  %v1297_v10 = vld [vmem:[%s1783_s2 + $0xd0] sm:$0xff] }
   0x4   :  { %827 = vmatprep.subr.mxu1 %v1242_v2  ;;  %897 = vmatprep.subr.mxu0 %v1242_v2  ;;  %v1276_v7 = vld [vmem:[%s1783_s2 + $0x60] sm:$0xff]  ;;  %v1290_v9 = vld [vmem:[%s1783_s2 + $0x58] sm:$0xff]  ;;  %v1304_v11 = vld [vmem:[%s1783_s2 + $0x50] sm:$0xff] }
   0x5   :  { %828 = vmatpush3.msra.mxu1 %v1248_v3  ;;  %898 = vmatpush3.msra.mxu0 %v1248_v3  ;;  %v1311_v12 = vld [vmem:[%s1783_s2 + $0xc8] sm:$0xff]  ;;  %v64_v13 = vld [vmem:[%s1784_s1] sm:$0xff]  ;;  %v1341_v17 = vld [vmem:[%s1783_s2 + $0xb8] sm:$0xff] }
   0x6   :  { %829 = vmatprep.subr.mxu1 %v1255_v4  ;;  %899 = vmatprep.subr.mxu0 %v1255_v4  ;;  %v1321_v14 = vld [vmem:[%s1783_s2 + $0x48] sm:$0xff]  ;;  %v1327_v15 = vld [vmem:[%s1783_s2 + $0xc0] sm:$0xff]  ;;  %v1348_v18 = vld [vmem:[%s1783_s2 + $0x38] sm:$0xff] }
   0x7   :  { %830 = vmatpush3.msra.mxu1 %v1262_v5  ;;  %900 = vmatpush3.msra.mxu0 %v1262_v5  ;;  %v1334_v16 = vld [vmem:[%s1783_s2 + $0x40] sm:$0xff]  ;;  %v1355_v19 = vld [vmem:[%s1783_s2 + $0xb0] sm:$0xff]  ;;  %v1369_v21 = vld [vmem:[%s1783_s2 + $0xa8] sm:$0xff] }
   0x8   :  { %831 = vmatprep.subr.mxu1 %v1269_v6  ;;  %901 = vmatprep.subr.mxu0 %v1269_v6  ;;  %v1362_v20 = vld [vmem:[%s1783_s2 + $0x30] sm:$0xff]  ;;  %v1376_v22 = vld [vmem:[%s1783_s2 + $0x28] sm:$0xff]  ;;  %v1383_v23 = vld [vmem:[%s1783_s2 + $0xa0] sm:$0xff] }
   0x9   :  { %832 = vmatpush3.msra.mxu1 %v1276_v7  ;;  %902 = vmatpush3.msra.mxu0 %v1276_v7  ;;  %v1390_v24 = vld [vmem:[%s1783_s2 + $0x20] sm:$0xff]  ;;  %v1397_v25 = vld [vmem:[%s1783_s2 + $0x98] sm:$0xff]  ;;  %v1411_v27 = vld [vmem:[%s1783_s2 + $0x90] sm:$0xff] }
   0xa   :  { %833 = vmatprep.subr.mxu1 %v1283_v8  ;;  %903 = vmatprep.subr.mxu0 %v1283_v8  ;;  %v1404_v26 = vld [vmem:[%s1783_s2 + $0x18] sm:$0xff]  ;;  %v1418_v28 = vld [vmem:[%s1783_s2 + $0x10] sm:$0xff]  ;;  %v1425_v29 = vld [vmem:[%s1783_s2 + $0x88] sm:$0xff] }
   0xb   :  { %834 = vmatpush3.msra.mxu1 %v1290_v9  ;;  %904 = vmatpush3.msra.mxu0 %v1290_v9  ;;  %v1432_v30 = vld [vmem:[%s1783_s2 + $0x8] sm:$0xff]  ;;  %v1439_v31 = vld [vmem:[%s1783_s2 + $0x80] sm:$0xff]  ;;  %v818_v45 = vld [vmem:[%s1785_s0 + $0x10] sm:$0xff] }
   0xc   :  { %835 = vmatprep.subr.mxu1 %v1297_v10  ;;  %130 = vmatprep.mubr.f32.mxu1 %v64_v13  ;;  %v1446_v32 = vld [vmem:[%s1783_s2] sm:$0xff]  ;;  %v817_v39 = vld [vmem:[%s1785_s0 + $0x8] sm:$0xff]  ;;  %v819_v51 = vld [vmem:[%s1785_s0 + $0x18] sm:$0xff] }
   0xd   :  { %836 = vmatpush3.msra.mxu1 %v1304_v11  ;;  %905 = vmatprep.subr.mxu0 %v1297_v10  ;;  %v65_v33 = vld [vmem:[%s1785_s0] sm:$0xff]  ;;  %v821_v63 = vld [vmem:[%s1785_s0 + $0x28] sm:$0xff] }
   0xe   :  { %837 = vmatprep.subr.mxu1 %v1311_v12  ;;  %906 = vmatpush3.msra.mxu0 %v1304_v11  ;;  %v1496_v35 = vld [vmem:[%s1786_s3] ss:$0 sm:$0xff]  ;;  %v681_v13 = vld [vmem:[%s1787_s4 + $0x48] sm:$0xff] }
   0xf   :  { %838 = vmatpush3.msra.mxu1 %v1321_v14  ;;  %907 = vmatprep.subr.mxu0 %v1311_v12  ;;  %v820_v57 = vld [vmem:[%s1785_s0 + $0x20] sm:$0xff] }
  0x10   :  { %839 = vmatprep.subr.mxu1 %v1327_v15  ;;  %908 = vmatpush3.msra.mxu0 %v1321_v14 }
  0x11   :  { %840 = vmatpush3.msra.mxu1 %v1334_v16  ;;  %909 = vmatprep.subr.mxu0 %v1327_v15 }
  0x12   :  { %841 = vmatprep.subr.mxu1 %v1341_v17  ;;  %910 = vmatpush3.msra.mxu0 %v1334_v16 }
  0x13   :  { %842 = vmatpush3.msra.mxu1 %v1348_v18  ;;  %911 = vmatprep.subr.mxu0 %v1341_v17 }
  0x14   :  { %843 = vmatprep.subr.mxu1 %v1355_v19  ;;  %912 = vmatpush3.msra.mxu0 %v1348_v18 }
  0x15   :  { %844 = vmatpush3.msra.mxu1 %v1362_v20  ;;  %913 = vmatprep.subr.mxu0 %v1355_v19 }
  0x16   :  { %845 = vmatprep.subr.mxu1 %v1369_v21  ;;  %914 = vmatpush3.msra.mxu0 %v1362_v20 }
  0x17   :  { %846 = vmatpush3.msra.mxu1 %v1376_v22  ;;  %915 = vmatprep.subr.mxu0 %v1369_v21 }
  0x18   :  { %847 = vmatprep.subr.mxu1 %v1383_v23  ;;  %916 = vmatpush3.msra.mxu0 %v1376_v22 }
  0x19   :  { %848 = vmatpush3.msra.mxu1 %v1390_v24  ;;  %917 = vmatprep.subr.mxu0 %v1383_v23 }
  0x1a   :  { %849 = vmatprep.subr.mxu1 %v1397_v25  ;;  %918 = vmatpush3.msra.mxu0 %v1390_v24 }
  0x1b   :  { %850 = vmatpush3.msra.mxu1 %v1404_v26  ;;  %919 = vmatprep.subr.mxu0 %v1397_v25 }
  0x1c   :  { %851 = vmatprep.subr.mxu1 %v1411_v27  ;;  %920 = vmatpush3.msra.mxu0 %v1404_v26 }
  0x1d   :  { %852 = vmatpush3.msra.mxu1 %v1418_v28  ;;  %921 = vmatprep.subr.mxu0 %v1411_v27 }
  0x1e   :  { %853 = vmatprep.subr.mxu1 %v1425_v29  ;;  %922 = vmatpush3.msra.mxu0 %v1418_v28 }
  0x1f   :  { %854 = vmatpush3.msra.mxu1 %v1432_v30  ;;  %923 = vmatprep.subr.mxu0 %v1425_v29 }
  0x20   :  { %855 = vmatprep.subr.mxu1 %v1439_v31  ;;  %924 = vmatpush3.msra.mxu0 %v1432_v30 }
  0x21   :  { %856 = vmatpush3.msra.mxu1 %v1446_v32  ;;  %925 = vmatprep.subr.mxu0 %v1439_v31 }
  0x22   :  { %131 = vmatmul.mubr.f32.vlgmr.msra.gmra.mxu1 %v65_v33  ;;  %860 = vmatprep.subr.mxu1 %v1232_v0 }
  0x23   :  { %861 = vmatpush3.msra.mxu1 %v1237_v1  ;;  %926 = vmatpush3.msra.mxu0 %v1446_v32 }
  0x24   :  { %862 = vmatprep.subr.mxu1 %v1242_v2  ;;  %965 = vmatprep.subr.mxu0 %v1232_v0 }
  0x25   :  { %863 = vmatpush3.msra.mxu1 %v1248_v3 }
  0x26   :  { %864 = vmatprep.subr.mxu1 %v1255_v4 }
  0x27   :  { %865 = vmatpush3.msra.mxu1 %v1262_v5 }
  0x28   :  { %866 = vmatprep.subr.mxu1 %v1269_v6 }
  0x29   :  { %867 = vmatpush3.msra.mxu1 %v1276_v7 }
  0x2a   :  { %868 = vmatprep.subr.mxu1 %v1283_v8 }
  0x2b   :  { %869 = vmatpush3.msra.mxu1 %v1290_v9 }
  0x2c   :  { %870 = vmatprep.subr.mxu1 %v1297_v10 }
  0x2d   :  { %871 = vmatpush3.msra.mxu1 %v1304_v11 }
  0x2e   :  { %872 = vmatprep.subr.mxu1 %v1311_v12 }
  0x2f   :  { %873 = vmatpush3.msra.mxu1 %v1321_v14 }
  0x30   :  { %874 = vmatprep.subr.mxu1 %v1327_v15 }
  0x31   :  { %875 = vmatpush3.msra.mxu1 %v1334_v16 }
  0x32   :  { %876 = vmatprep.subr.mxu1 %v1341_v17 }
  0x33   :  { %877 = vmatpush3.msra.mxu1 %v1348_v18 }
  0x34   :  { %878 = vmatprep.subr.mxu1 %v1355_v19 }
  0x35   :  { %879 = vmatpush3.msra.mxu1 %v1362_v20 }
  0x36   :  { %880 = vmatprep.subr.mxu1 %v1369_v21 }
  0x37   :  { %881 = vmatpush3.msra.mxu1 %v1376_v22 }
  0x38   :  { %882 = vmatprep.subr.mxu1 %v1383_v23 }
  0x39   :  { %883 = vmatpush3.msra.mxu1 %v1390_v24 }
  0x3a   :  { %884 = vmatprep.subr.mxu1 %v1397_v25 }
  0x3b   :  { %885 = vmatpush3.msra.mxu1 %v1404_v26 }
  0x3c   :  { %886 = vmatprep.subr.mxu1 %v1411_v27 }
  0x3d   :  { %887 = vmatpush3.msra.mxu1 %v1418_v28 }
  0x3e   :  { %888 = vmatprep.subr.mxu1 %v1425_v29 }
  0x3f   :  { %889 = vmatpush3.msra.mxu1 %v1432_v30 }
  0x40   :  { %890 = vmatprep.subr.mxu1 %v1439_v31 }
  0x41   :  { %891 = vmatpush3.msra.mxu1 %v1446_v32 }
  0x42   :  { %930 = vmatprep.subr.mxu1 %v1232_v0 }
  0xe2   :  { %v857_v34 = vpop.f32.mrf.mxu1 }
  0xe4   :  { %v858_v36 = vpop.f32.mrf.mxu1 }
  0xe5   :  { %v859_v37 = vadd.f32 %v858_v36, %v857_v34 }
  0xe7   :  { %v133_v38 = vadd.f32 %v859_v37, %v1496_v35 }
  0xe9   :  { %1173 = vtanh.f32 %v133_v38 }
  0xf6   :  { %v1502_v40 = vpop.eup %1173 }
  0xf7   :  { %204 = vmatprep.mubr.f32.mxu1 %v1502_v40 }
  0xf8   :  { %205 = vmatmul.mubr.f32.vlgmr.msra.gmra.mxu1 %v817_v39 }
  0xf9   :  { %931 = vmatpush3.msra.mxu1 %v1237_v1 }
  0xfa   :  { %932 = vmatprep.subr.mxu1 %v1242_v2 }
  0xfb   :  { %933 = vmatpush3.msra.mxu1 %v1248_v3 }
  0xfc   :  { %934 = vmatprep.subr.mxu1 %v1255_v4 }
  0xfd   :  { %935 = vmatpush3.msra.mxu1 %v1262_v5 }
  0xfe   :  { %936 = vmatprep.subr.mxu1 %v1269_v6 }
  0xff   :  { %937 = vmatpush3.msra.mxu1 %v1276_v7 }
 0x100   :  { %938 = vmatprep.subr.mxu1 %v1283_v8 }
 0x101   :  { %939 = vmatpush3.msra.mxu1 %v1290_v9 }
 0x102   :  { %940 = vmatprep.subr.mxu1 %v1297_v10 }
 0x103   :  { %941 = vmatpush3.msra.mxu1 %v1304_v11 }
 0x104   :  { %942 = vmatprep.subr.mxu1 %v1311_v12 }
 0x105   :  { %943 = vmatpush3.msra.mxu1 %v1321_v14 }
 0x106   :  { %944 = vmatprep.subr.mxu1 %v1327_v15 }
 0x107   :  { %945 = vmatpush3.msra.mxu1 %v1334_v16 }
 0x108   :  { %946 = vmatprep.subr.mxu1 %v1341_v17 }
 0x109   :  { %947 = vmatpush3.msra.mxu1 %v1348_v18 }
 0x10a   :  { %948 = vmatprep.subr.mxu1 %v1355_v19 }
 0x10b   :  { %949 = vmatpush3.msra.mxu1 %v1362_v20 }
 0x10c   :  { %950 = vmatprep.subr.mxu1 %v1369_v21 }
 0x10d   :  { %951 = vmatpush3.msra.mxu1 %v1376_v22 }
 0x10e   :  { %952 = vmatprep.subr.mxu1 %v1383_v23 }
 0x10f   :  { %953 = vmatpush3.msra.mxu1 %v1390_v24 }
 0x110   :  { %954 = vmatprep.subr.mxu1 %v1397_v25 }
 0x111   :  { %955 = vmatpush3.msra.mxu1 %v1404_v26 }
 0x112   :  { %956 = vmatprep.subr.mxu1 %v1411_v27 }
 0x113   :  { %957 = vmatpush3.msra.mxu1 %v1418_v28 }
 0x114   :  { %958 = vmatprep.subr.mxu1 %v1425_v29 }
 0x115   :  { %959 = vmatpush3.msra.mxu1 %v1432_v30 }
 0x116   :  { %960 = vmatprep.subr.mxu1 %v1439_v31 }
 0x117   :  { %961 = vmatpush3.msra.mxu1 %v1446_v32 }
 0x118   :  { %1000 = vmatprep.subr.mxu1 %v1232_v0 }
 0x1b8   :  { %v892_v41 = vpop.f32.mrf.mxu1 }
 0x1ba   :  { %v893_v42 = vpop.f32.mrf.mxu1 }
 0x1bb   :  { %v894_v43 = vadd.f32 %v893_v42, %v892_v41 }
 0x1bd   :  { %v207_v44 = vadd.f32 %v894_v43, %v1496_v35 }
 0x1bf   :  { %1175 = vtanh.f32 %v207_v44 }
 0x1cc   :  { %v1541_v46 = vpop.eup %1175 }
 0x1cd   :  { %279 = vmatprep.mubr.f32.mxu0 %v1541_v46 }
 0x1ce   :  { %280 = vmatmul.mubr.f32.vlgmr.msra.gmra.mxu0 %v818_v45 }
 0x1cf   :  { %966 = vmatpush3.msra.mxu0 %v1237_v1 }
 0x1d0   :  { %967 = vmatprep.subr.mxu0 %v1242_v2 }
 0x1d1   :  { %968 = vmatpush3.msra.mxu0 %v1248_v3 }
 0x1d2   :  { %969 = vmatprep.subr.mxu0 %v1255_v4 }
 0x1d3   :  { %970 = vmatpush3.msra.mxu0 %v1262_v5 }
 0x1d4   :  { %971 = vmatprep.subr.mxu0 %v1269_v6 }
 0x1d5   :  { %972 = vmatpush3.msra.mxu0 %v1276_v7 }
 0x1d6   :  { %973 = vmatprep.subr.mxu0 %v1283_v8 }
 0x1d7   :  { %974 = vmatpush3.msra.mxu0 %v1290_v9 }
 0x1d8   :  { %975 = vmatprep.subr.mxu0 %v1297_v10 }
 0x1d9   :  { %976 = vmatpush3.msra.mxu0 %v1304_v11 }
 0x1da   :  { %977 = vmatprep.subr.mxu0 %v1311_v12 }
 0x1db   :  { %978 = vmatpush3.msra.mxu0 %v1321_v14 }
 0x1dc   :  { %979 = vmatprep.subr.mxu0 %v1327_v15 }
 0x1dd   :  { %980 = vmatpush3.msra.mxu0 %v1334_v16 }
 0x1de   :  { %981 = vmatprep.subr.mxu0 %v1341_v17 }
 0x1df   :  { %982 = vmatpush3.msra.mxu0 %v1348_v18 }
 0x1e0   :  { %983 = vmatprep.subr.mxu0 %v1355_v19 }
 0x1e1   :  { %984 = vmatpush3.msra.mxu0 %v1362_v20 }
 0x1e2   :  { %985 = vmatprep.subr.mxu0 %v1369_v21 }
 0x1e3   :  { %986 = vmatpush3.msra.mxu0 %v1376_v22 }
 0x1e4   :  { %987 = vmatprep.subr.mxu0 %v1383_v23 }
 0x1e5   :  { %988 = vmatpush3.msra.mxu0 %v1390_v24 }
 0x1e6   :  { %989 = vmatprep.subr.mxu0 %v1397_v25 }
 0x1e7   :  { %990 = vmatpush3.msra.mxu0 %v1404_v26 }
 0x1e8   :  { %991 = vmatprep.subr.mxu0 %v1411_v27 }
 0x1e9   :  { %992 = vmatpush3.msra.mxu0 %v1418_v28 }
 0x1ea   :  { %993 = vmatprep.subr.mxu0 %v1425_v29 }
 0x1eb   :  { %994 = vmatpush3.msra.mxu0 %v1432_v30 }
 0x1ec   :  { %995 = vmatprep.subr.mxu0 %v1439_v31 }
 0x1ed   :  { %996 = vmatpush3.msra.mxu0 %v1446_v32 }
 0x1ee   :  { %1035 = vmatprep.subr.mxu0 %v1232_v0 }
 0x28e   :  { %v927_v47 = vpop.f32.mrf.mxu0 }
 0x290   :  { %v928_v48 = vpop.f32.mrf.mxu0 }
 0x291   :  { %v929_v49 = vadd.f32 %v928_v48, %v927_v47 }
 0x293   :  { %v282_v50 = vadd.f32 %v929_v49, %v1496_v35 }
 0x295   :  { %1177 = vtanh.f32 %v282_v50 }
 0x2a2   :  { %v1580_v52 = vpop.eup %1177 }
 0x2a3   :  { %354 = vmatprep.mubr.f32.mxu1 %v1580_v52 }
 0x2a4   :  { %355 = vmatmul.mubr.f32.vlgmr.msra.gmra.mxu1 %v819_v51 }
 0x2a5   :  { %1001 = vmatpush3.msra.mxu1 %v1237_v1 }
 0x2a6   :  { %1002 = vmatprep.subr.mxu1 %v1242_v2 }
 0x2a7   :  { %1003 = vmatpush3.msra.mxu1 %v1248_v3 }
 0x2a8   :  { %1004 = vmatprep.subr.mxu1 %v1255_v4 }
 0x2a9   :  { %1005 = vmatpush3.msra.mxu1 %v1262_v5 }
 0x2aa   :  { %1006 = vmatprep.subr.mxu1 %v1269_v6 }
 0x2ab   :  { %1007 = vmatpush3.msra.mxu1 %v1276_v7 }
 0x2ac   :  { %1008 = vmatprep.subr.mxu1 %v1283_v8 }
 0x2ad   :  { %1009 = vmatpush3.msra.mxu1 %v1290_v9 }
 0x2ae   :  { %1010 = vmatprep.subr.mxu1 %v1297_v10 }
 0x2af   :  { %1011 = vmatpush3.msra.mxu1 %v1304_v11 }
 0x2b0   :  { %1012 = vmatprep.subr.mxu1 %v1311_v12 }
 0x2b1   :  { %1013 = vmatpush3.msra.mxu1 %v1321_v14 }
 0x2b2   :  { %1014 = vmatprep.subr.mxu1 %v1327_v15 }
 0x2b3   :  { %1015 = vmatpush3.msra.mxu1 %v1334_v16 }
 0x2b4   :  { %1016 = vmatprep.subr.mxu1 %v1341_v17 }
 0x2b5   :  { %1017 = vmatpush3.msra.mxu1 %v1348_v18 }
 0x2b6   :  { %1018 = vmatprep.subr.mxu1 %v1355_v19 }
 0x2b7   :  { %1019 = vmatpush3.msra.mxu1 %v1362_v20 }
 0x2b8   :  { %1020 = vmatprep.subr.mxu1 %v1369_v21 }
 0x2b9   :  { %1021 = vmatpush3.msra.mxu1 %v1376_v22 }
 0x2ba   :  { %1022 = vmatprep.subr.mxu1 %v1383_v23 }
 0x2bb   :  { %1023 = vmatpush3.msra.mxu1 %v1390_v24 }
 0x2bc   :  { %1024 = vmatprep.subr.mxu1 %v1397_v25 }
 0x2bd   :  { %1025 = vmatpush3.msra.mxu1 %v1404_v26 }
 0x2be   :  { %1026 = vmatprep.subr.mxu1 %v1411_v27 }
 0x2bf   :  { %1027 = vmatpush3.msra.mxu1 %v1418_v28 }
 0x2c0   :  { %1028 = vmatprep.subr.mxu1 %v1425_v29 }
 0x2c1   :  { %1029 = vmatpush3.msra.mxu1 %v1432_v30 }
 0x2c2   :  { %1030 = vmatprep.subr.mxu1 %v1439_v31 }
 0x2c3   :  { %1031 = vmatpush3.msra.mxu1 %v1446_v32 }
 0x2c4   :  { %1070 = vmatprep.subr.mxu1 %v1232_v0 }
 0x364   :  { %v962_v53 = vpop.f32.mrf.mxu1 }
 0x366   :  { %v963_v54 = vpop.f32.mrf.mxu1 }
 0x367   :  { %v964_v55 = vadd.f32 %v963_v54, %v962_v53 }
 0x369   :  { %v357_v56 = vadd.f32 %v964_v55, %v1496_v35 }
 0x36b   :  { %1179 = vtanh.f32 %v357_v56 }
 0x378   :  { %v1619_v58 = vpop.eup %1179 }
 0x379   :  { %429 = vmatprep.mubr.f32.mxu0 %v1619_v58 }
 0x37a   :  { %430 = vmatmul.mubr.f32.vlgmr.msra.gmra.mxu0 %v820_v57 }
 0x37b   :  { %1036 = vmatpush3.msra.mxu0 %v1237_v1 }
 0x37c   :  { %1037 = vmatprep.subr.mxu0 %v1242_v2 }
 0x37d   :  { %1038 = vmatpush3.msra.mxu0 %v1248_v3 }
 0x37e   :  { %1039 = vmatprep.subr.mxu0 %v1255_v4 }
 0x37f   :  { %1040 = vmatpush3.msra.mxu0 %v1262_v5 }
 0x380   :  { %1041 = vmatprep.subr.mxu0 %v1269_v6 }
 0x381   :  { %1042 = vmatpush3.msra.mxu0 %v1276_v7 }
 0x382   :  { %1043 = vmatprep.subr.mxu0 %v1283_v8 }
 0x383   :  { %1044 = vmatpush3.msra.mxu0 %v1290_v9 }
 0x384   :  { %1045 = vmatprep.subr.mxu0 %v1297_v10 }
 0x385   :  { %1046 = vmatpush3.msra.mxu0 %v1304_v11 }
 0x386   :  { %1047 = vmatprep.subr.mxu0 %v1311_v12 }
 0x387   :  { %1048 = vmatpush3.msra.mxu0 %v1321_v14 }
 0x388   :  { %1049 = vmatprep.subr.mxu0 %v1327_v15 }
 0x389   :  { %1050 = vmatpush3.msra.mxu0 %v1334_v16 }
 0x38a   :  { %1051 = vmatprep.subr.mxu0 %v1341_v17 }
 0x38b   :  { %1052 = vmatpush3.msra.mxu0 %v1348_v18 }
 0x38c   :  { %1053 = vmatprep.subr.mxu0 %v1355_v19 }
 0x38d   :  { %1054 = vmatpush3.msra.mxu0 %v1362_v20 }
 0x38e   :  { %1055 = vmatprep.subr.mxu0 %v1369_v21 }
 0x38f   :  { %1056 = vmatpush3.msra.mxu0 %v1376_v22 }
 0x390   :  { %1057 = vmatprep.subr.mxu0 %v1383_v23 }
 0x391   :  { %1058 = vmatpush3.msra.mxu0 %v1390_v24 }
 0x392   :  { %1059 = vmatprep.subr.mxu0 %v1397_v25 }
 0x393   :  { %1060 = vmatpush3.msra.mxu0 %v1404_v26 }
 0x394   :  { %1061 = vmatprep.subr.mxu0 %v1411_v27 }
 0x395   :  { %1062 = vmatpush3.msra.mxu0 %v1418_v28 }
 0x396   :  { %1063 = vmatprep.subr.mxu0 %v1425_v29 }
 0x397   :  { %1064 = vmatpush3.msra.mxu0 %v1432_v30 }
 0x398   :  { %1065 = vmatprep.subr.mxu0 %v1439_v31 }
 0x399   :  { %1066 = vmatpush3.msra.mxu0 %v1446_v32 }
 0x43a   :  { %v997_v59 = vpop.f32.mrf.mxu0 }
 0x43c   :  { %v998_v60 = vpop.f32.mrf.mxu0 }
 0x43d   :  { %v999_v61 = vadd.f32 %v998_v60, %v997_v59 }
 0x43f   :  { %v432_v62 = vadd.f32 %v999_v61, %v1496_v35 }
 0x441   :  { %1181 = vtanh.f32 %v432_v62 }
 0x44e   :  { %v1657_v0 = vpop.eup %1181 }
 0x44f   :  { %504 = vmatprep.mubr.f32.mxu1 %v1657_v0 }
 0x450   :  { %505 = vmatmul.mubr.f32.vlgmr.msra.gmra.mxu1 %v821_v63 }
 0x451   :  { %1071 = vmatpush3.msra.mxu1 %v1237_v1  ;;  %v687_v1 = vld [vmem:[%s1787_s4 + $0x78] sm:$0xff] }
 0x452   :  { %1072 = vmatprep.subr.mxu1 %v1242_v2  ;;  %1129 = vmatprep.subr.mxu0 %v687_v1 }
 0x453   :  { %1073 = vmatpush3.msra.mxu1 %v1248_v3 }
 0x454   :  { %1074 = vmatprep.subr.mxu1 %v1255_v4 }
 0x455   :  { %1075 = vmatpush3.msra.mxu1 %v1262_v5 }
 0x456   :  { %1076 = vmatprep.subr.mxu1 %v1269_v6  ;;  %v822_v6 = vld [vmem:[%s1785_s0 + $0x30] sm:$0xff] }
 0x457   :  { %1077 = vmatpush3.msra.mxu1 %v1276_v7 }
 0x458   :  { %1078 = vmatprep.subr.mxu1 %v1283_v8  ;;  %v686_v8 = vld [vmem:[%s1787_s4 + $0x70] sm:$0xff] }
 0x459   :  { %1079 = vmatpush3.msra.mxu1 %v1290_v9  ;;  %v685_v9 = vld [vmem:[%s1787_s4 + $0x68] sm:$0xff] }
 0x45a   :  { %1080 = vmatprep.subr.mxu1 %v1297_v10  ;;  %v684_v10 = vld [vmem:[%s1787_s4 + $0x60] sm:$0xff] }
 0x45b   :  { %1081 = vmatpush3.msra.mxu1 %v1304_v11  ;;  %v683_v11 = vld [vmem:[%s1787_s4 + $0x58] sm:$0xff] }
 0x45c   :  { %1082 = vmatprep.subr.mxu1 %v1311_v12  ;;  %v682_v12 = vld [vmem:[%s1787_s4 + $0x50] sm:$0xff] }
 0x45d   :  { %1083 = vmatpush3.msra.mxu1 %v1321_v14  ;;  %v680_v14 = vld [vmem:[%s1787_s4 + $0x40] sm:$0xff] }
 0x45e   :  { %1084 = vmatprep.subr.mxu1 %v1327_v15  ;;  %v679_v15 = vld [vmem:[%s1787_s4 + $0x38] sm:$0xff] }
 0x45f   :  { %1085 = vmatpush3.msra.mxu1 %v1334_v16  ;;  %v678_v16 = vld [vmem:[%s1787_s4 + $0x30] sm:$0xff] }
 0x460   :  { %1086 = vmatprep.subr.mxu1 %v1341_v17  ;;  %v677_v17 = vld [vmem:[%s1787_s4 + $0x28] sm:$0xff] }
 0x461   :  { %1087 = vmatpush3.msra.mxu1 %v1348_v18  ;;  %v676_v18 = vld [vmem:[%s1787_s4 + $0x20] sm:$0xff] }
 0x462   :  { %1088 = vmatprep.subr.mxu1 %v1355_v19  ;;  %v675_v19 = vld [vmem:[%s1787_s4 + $0x18] sm:$0xff] }
 0x463   :  { %1089 = vmatpush3.msra.mxu1 %v1362_v20  ;;  %v674_v20 = vld [vmem:[%s1787_s4 + $0x10] sm:$0xff] }
 0x464   :  { %1090 = vmatprep.subr.mxu1 %v1369_v21  ;;  %v673_v21 = vld [vmem:[%s1787_s4 + $0x8] sm:$0xff] }
 0x465   :  { %1091 = vmatpush3.msra.mxu1 %v1376_v22  ;;  %v672_v22 = vld [vmem:[%s1787_s4] sm:$0xff] }
 0x466   :  { %1092 = vmatprep.subr.mxu1 %v1383_v23 }
 0x467   :  { %1093 = vmatpush3.msra.mxu1 %v1390_v24 }
 0x468   :  { %1094 = vmatprep.subr.mxu1 %v1397_v25 }
 0x469   :  { %1095 = vmatpush3.msra.mxu1 %v1404_v26 }
 0x46a   :  { %1096 = vmatprep.subr.mxu1 %v1411_v27  ;;  %v823_v27 = vld [vmem:[%s1785_s0 + $0x38] sm:$0xff] }
 0x46b   :  { %1097 = vmatpush3.msra.mxu1 %v1418_v28 }
 0x46c   :  { %1098 = vmatprep.subr.mxu1 %v1425_v29  ;;  %v824_v29 = vld [vmem:[%s1788_s5] ss:$0 sm:$0xff] }
 0x46d   :  { %1099 = vmatpush3.msra.mxu1 %v1432_v30 }
 0x46e   :  { %1100 = vmatprep.subr.mxu1 %v1439_v31 }
 0x46f   :  { %1101 = vmatpush3.msra.mxu1 %v1446_v32 }
 0x510   :  { %v1032_v2 = vpop.f32.mrf.mxu1 }
 0x512   :  { %v1033_v3 = vpop.f32.mrf.mxu1 }
 0x513   :  { %v1034_v4 = vadd.f32 %v1033_v3, %v1032_v2 }
 0x515   :  { %v507_v5 = vadd.f32 %v1034_v4, %v1496_v35 }
 0x517   :  { %1183 = vtanh.f32 %v507_v5 }
 0x524   :  { %v1184_v7 = vpop.eup %1183 }
 0x525   :  { %579 = vmatprep.mubr.f32.mxu0 %v1184_v7 }
 0x526   :  { %580 = vmatmul.mubr.f32.vlgmr.msra.gmra.mxu0 %v822_v6 }
 0x527   :  { %1130 = vmatpush3.msra.mxu0 %v687_v1  ;;  %1161 = vmatprep.mubr.f32.mxu0 %v1502_v40 }
 0x528   :  { %1131 = vmatprep.subr.mxu0 %v686_v8 }
 0x529   :  { %1132 = vmatpush3.msra.mxu0 %v686_v8 }
 0x52a   :  { %1133 = vmatprep.subr.mxu0 %v685_v9 }
 0x52b   :  { %1134 = vmatpush3.msra.mxu0 %v685_v9 }
 0x52c   :  { %1135 = vmatprep.subr.mxu0 %v684_v10 }
 0x52d   :  { %1136 = vmatpush3.msra.mxu0 %v684_v10 }
 0x52e   :  { %1137 = vmatprep.subr.mxu0 %v683_v11 }
 0x52f   :  { %1138 = vmatpush3.msra.mxu0 %v683_v11 }
 0x530   :  { %1139 = vmatprep.subr.mxu0 %v682_v12 }
 0x531   :  { %1140 = vmatpush3.msra.mxu0 %v682_v12 }
 0x532   :  { %1141 = vmatprep.subr.mxu0 %v681_v13 }
 0x533   :  { %1142 = vmatpush3.msra.mxu0 %v681_v13 }
 0x534   :  { %1143 = vmatprep.subr.mxu0 %v680_v14 }
 0x535   :  { %1144 = vmatpush3.msra.mxu0 %v680_v14 }
 0x536   :  { %1145 = vmatprep.subr.mxu0 %v679_v15 }
 0x537   :  { %1146 = vmatpush3.msra.mxu0 %v679_v15 }
 0x538   :  { %1147 = vmatprep.subr.mxu0 %v678_v16 }
 0x539   :  { %1148 = vmatpush3.msra.mxu0 %v678_v16 }
 0x53a   :  { %1149 = vmatprep.subr.mxu0 %v677_v17 }
 0x53b   :  { %1150 = vmatpush3.msra.mxu0 %v677_v17 }
 0x53c   :  { %1151 = vmatprep.subr.mxu0 %v676_v18 }
 0x53d   :  { %1152 = vmatpush3.msra.mxu0 %v676_v18 }
 0x53e   :  { %1153 = vmatprep.subr.mxu0 %v675_v19 }
 0x53f   :  { %1154 = vmatpush3.msra.mxu0 %v675_v19 }
 0x540   :  { %1155 = vmatprep.subr.mxu0 %v674_v20 }
 0x541   :  { %1156 = vmatpush3.msra.mxu0 %v674_v20 }
 0x542   :  { %1157 = vmatprep.subr.mxu0 %v673_v21 }
 0x543   :  { %1158 = vmatpush3.msra.mxu0 %v673_v21 }
 0x544   :  { %1159 = vmatprep.subr.mxu0 %v672_v22 }
 0x545   :  { %1160 = vmatpush3.msra.mxu0 %v672_v22 }
 0x546   :  { %1162 = vmatmul.mubr.f32.vlgmr.msra.gmra.mxu0 %v1541_v46 }
 0x547   :  { %1164 = vmatprep.mubr.f32.mxu0 %v1580_v52 }
 0x54a   :  { %1165 = vmatmul.mubr.f32.gmra.mxu0 %v1619_v58 }
 0x54b   :  { %1167 = vmatprep.mubr.f32.mxu0 %v1657_v0 }
 0x54e   :  { %1168 = vmatmul.mubr.f32.gmra.mxu0 %v1184_v7 }
 0x5e6   :  { %v1067_v23 = vpop.f32.mrf.mxu0 }
 0x5e8   :  { %v1068_v24 = vpop.f32.mrf.mxu0 }
 0x5e9   :  { %v1069_v25 = vadd.f32 %v1068_v24, %v1067_v23 }
 0x5eb   :  { %v582_v26 = vadd.f32 %v1069_v25, %v1496_v35 }
 0x5ed   :  { %1185 = vtanh.f32 %v582_v26 }
 0x5fa   :  { %v1186_v28 = vpop.eup %1185 }
 0x5fb   :  { %654 = vmatprep.mubr.f32.mxu1 %v1186_v28  ;;  %1170 = vmatprep.mubr.f32.mxu0 %v1186_v28 }
 0x5fc   :  { %655 = vmatmul.mubr.f32.vlgmr.msra.gmra.mxu1 %v823_v27 }
 0x606   :  { %v1163_v30 = vpop.f32.mrf.mxu0 }
 0x607   :  { %v767_v31 = vadd.f32 %v1163_v30, %v824_v29 }
 0x608   :  { %v761_v32 = vpop.f32.mrf.mxu0 }
 0x609   :  { %801 = vst [vmem:[%s1789_s6 + $0x8] sm:$0xff] %v767_v31  ;;  %v762_v33 = vadd.f32 %v824_v29, %v761_v32 }
 0x60a   :  { %v1166_v34 = vpop.f32.mrf.mxu0 }
 0x60b   :  { %800 = vst [vmem:[%s1789_s6] sm:$0xff] %v762_v33  ;;  %v777_v36 = vadd.f32 %v1166_v34, %v824_v29 }
 0x60c   :  { %v771_v37 = vpop.f32.mrf.mxu0 }
 0x60d   :  { %803 = vst [vmem:[%s1789_s6 + $0x18] sm:$0xff] %v777_v36  ;;  %v772_v38 = vadd.f32 %v824_v29, %v771_v37 }
 0x60e   :  { %v1169_v39 = vpop.f32.mrf.mxu0 }
 0x60f   :  { %802 = vst [vmem:[%s1789_s6 + $0x10] sm:$0xff] %v772_v38  ;;  %v787_v40 = vadd.f32 %v1169_v39, %v824_v29 }
 0x610   :  { %v781_v41 = vpop.f32.mrf.mxu0 }
 0x611   :  { %805 = vst [vmem:[%s1789_s6 + $0x28] sm:$0xff] %v787_v40  ;;  %v782_v42 = vadd.f32 %v824_v29, %v781_v41 }
 0x613   :  { %804 = vst [vmem:[%s1789_s6 + $0x20] sm:$0xff] %v782_v42 }
 0x6bc   :  { %v1102_v43 = vpop.f32.mrf.mxu1 }
 0x6be   :  { %v1103_v44 = vpop.f32.mrf.mxu1 }
 0x6bf   :  { %v1104_v45 = vadd.f32 %v1103_v44, %v1102_v43 }
 0x6c1   :  { %v657_v46 = vadd.f32 %v1104_v45, %v1496_v35 }
 0x6c3   :  { %1187 = vtanh.f32 %v657_v46 }
 0x6d0   :  { %v1188_v47 = vpop.eup %1187 }
 0x6d1   :  { %663 = vst [vmem:[%s1790_s7] sm:$0xff] %v1188_v47  ;;  %1171 = vmatmul.mubr.f32.gmra.mxu0 %v1188_v47 }
 0x791   :  { %v1172_v48 = vpop.f32.mrf.mxu0 }
 0x792   :  { %v797_v49 = vadd.f32 %v1172_v48, %v824_v29 }
 0x793   :  { %v791_v50 = vpop.f32.mrf.mxu0 }
 0x794   :  { %807 = vst [vmem:[%s1789_s6 + $0x38] sm:$0xff] %v797_v49  ;;  %v792_v51 = vadd.f32 %v824_v29, %v791_v50 }
 0x796   :  { %806 = vst [vmem:[%s1789_s6 + $0x30] sm:$0xff] %v792_v51 }

</bundles_post_ra>
